<compile_context>
chip_gen: v5e
topology: v5e:2x2
jax: 0.10.0
libtpu: 0.0.40
codegen_flags: <defaults>
</compile_context>

<pallas_src>
import jax
import jax.numpy as jnp
from jax.experimental import pallas as pl
from jax.experimental.pallas import tpu as pltpu

_NUM_CLASSES = 3        # one_hot(action, num_classes=3) in the PyTorch module
_NUM_CLASSES_PAD = 8    # pad the action-embedding rows to a sublane multiple
_LANE = 128


def _round_up(x, m):
    return ((x + m - 1) // m) * m


def _mlp_kernel(state_ref, act_ref, w1s_ref, w1a_ref, b1_ref, w2_ref, b2_ref,
                o_ref):
    # state: [TB, D_state] f32     act:  [TB, 1] int32
    # w1s:   [D_state, H]  bf16    w1a:  [8, H] bf16 (rows >=3 are zero)
    # b1:    [1, H] f32            w2:   [H, D_out_pad] bf16 (cols >= d_out zero)
    # b2:    [1, D_out_pad] f32    o:    [TB, D_out_pad] f32
    cdt = w1s_ref.dtype
    tb = act_ref.shape[0]
    n_cls = w1a_ref.shape[0]

    x = state_ref[...].astype(cdt)
    # Fused one-hot(action): built in-kernel, no concatenated input in HBM.
    one_hot = (jax.lax.broadcasted_iota(jnp.int32, (tb, n_cls), 1)
               == act_ref[...]).astype(cdt)

    h = jnp.dot(x, w1s_ref[...], preferred_element_type=jnp.float32)
    h = h + jnp.dot(one_hot, w1a_ref[...], preferred_element_type=jnp.float32)
    h = jnp.maximum(h + b1_ref[...], 0.0)                      # bias + ReLU in f32

    y = jnp.dot(h.astype(cdt), w2_ref[...], preferred_element_type=jnp.float32)
    o_ref[...] = (y + b2_ref[...]).astype(o_ref.dtype)


def init_params(key, input_dim, action_dim, output_dim, hidden=128):
    """PyTorch-equivalent raw parameters (f32), mimicking nn.Linear init."""
    k1, k2, k3, k4 = jax.random.split(key, 4)
    d_in = input_dim + action_dim
    bound1 = 1.0 / jnp.sqrt(d_in)
    bound2 = 1.0 / jnp.sqrt(hidden)
    w1 = jax.random.uniform(k1, (d_in, hidden), jnp.float32, -bound1, bound1)
    b1 = jax.random.uniform(k2, (1, hidden), jnp.float32, -bound1, bound1)
    w2 = jax.random.uniform(k3, (hidden, output_dim), jnp.float32, -bound2, bound2)
    b2 = jax.random.uniform(k4, (1, output_dim), jnp.float32, -bound2, bound2)
    return (w1, b1, w2, b2)


def prepare_params(params, input_dim, compute_dtype=jnp.bfloat16):
    """One-time reshaping of the raw params for the fused kernel:
    split w1 into state/action parts, zero-pad w2/b2 to a lane-dense (128) width,
    and cast matmul operands to the MXU-friendly compute dtype (bf16 by default)."""
    w1, b1, w2, b2 = params
    d_in_total, hidden = w1.shape
    n_cls = d_in_total - input_dim
    d_out = w2.shape[1]
    d_out_p = _round_up(d_out, _LANE)

    w1_state = w1[:input_dim].astype(compute_dtype)
    w1_act = jnp.zeros((_NUM_CLASSES_PAD, hidden), compute_dtype)
    w1_act = w1_act.at[:n_cls].set(w1[input_dim:].astype(compute_dtype))

    w2_p = jnp.zeros((hidden, d_out_p), compute_dtype)
    w2_p = w2_p.at[:, :d_out].set(w2.astype(compute_dtype))
    b2_p = jnp.zeros((1, d_out_p), jnp.float32).at[:, :d_out].set(
        b2.reshape(1, d_out).astype(jnp.float32))
    b1_p = b1.reshape(1, hidden).astype(jnp.float32)

    return {"w1_state": w1_state, "w1_act": w1_act, "b1": b1_p,
            "w2": w2_p, "b2": b2_p}


def dynamics_model_forward(state, action, prepared, output_dim, *, block_b=512):
    """Equivalent of DynamicsModel.forward(state, action).

    state:  f32[B, input_dim]
    action: int[B]  (values in {0,1,2})
    """
    w1s, w1a = prepared["w1_state"], prepared["w1_act"]
    b1, w2, b2 = prepared["b1"], prepared["w2"], prepared["b2"]

    B, input_dim = state.shape
    hidden = w1s.shape[1]
    d_out_p = w2.shape[1]
    n_cls_pad = w1a.shape[0]

    # Batch tile: multiple of 8 sublanes, capped at block_b rows.
    tb = min(block_b, _round_up(B, 8))
    bp = _round_up(B, tb)

    state = state.astype(jnp.float32)
    act = action.astype(jnp.int32).reshape(B, 1)
    if bp != B:
        state = jnp.pad(state, ((0, bp - B), (0, 0)))
        act = jnp.pad(act, ((0, bp - B), (0, 0)))

    out = pl.pallas_call(
        _mlp_kernel,
        out_shape=jax.ShapeDtypeStruct((bp, d_out_p), jnp.float32),
        grid=(bp // tb,),
        in_specs=[
            pl.BlockSpec((tb, input_dim), lambda i: (i, 0)),      # state tile
            pl.BlockSpec((tb, 1), lambda i: (i, 0)),              # action tile
            pl.BlockSpec((input_dim, hidden), lambda i: (0, 0)),  # w1_state (resident)
            pl.BlockSpec((n_cls_pad, hidden), lambda i: (0, 0)),  # w1_act   (resident)
            pl.BlockSpec((1, hidden), lambda i: (0, 0)),          # b1       (resident)
            pl.BlockSpec((hidden, d_out_p), lambda i: (0, 0)),    # w2       (resident)
            pl.BlockSpec((1, d_out_p), lambda i: (0, 0)),         # b2       (resident)
        ],
        out_specs=pl.BlockSpec((tb, d_out_p), lambda i: (i, 0)),  # lane-dense out
        compiler_params=pltpu.CompilerParams(
            dimension_semantics=("parallel",)),
    )(state, act, w1s, w1a, b1, w2, b2)

    return out[:B, :output_dim]


if __name__ == "__main__":
    # Small, module-consistent shapes: action space of 3 (one-hot num_classes=3).
    batch = 8
    input_dim = 29       # e.g. stock-trading observation size
    action_dim = 3       # must be 3 to match num_classes=3 in forward()
    output_dim = 29      # dynamics model predicts next state

    key = jax.random.PRNGKey(0)
    k_state, k_action, k_params = jax.random.split(key, 3)

    state = jax.random.normal(k_state, (batch, input_dim), jnp.float32)
    action = jax.random.randint(k_action, (batch,), 0, 3, jnp.int32)

    params = init_params(k_params, input_dim, action_dim, output_dim)
    prepared = prepare_params(params, input_dim)  # bf16 matmul operands

    out = dynamics_model_forward(state, action, prepared, output_dim)
    out = jax.block_until_ready(out)

    # Pure-JAX f32 reference check (tolerance loosened for bf16 MXU inputs).
    w1, b1, w2, b2 = params
    x_ref = jnp.concatenate(
        [state, jax.nn.one_hot(action, 3, dtype=jnp.float32)], axis=1)
    h_ref = jnp.maximum(x_ref @ w1 + b1, 0.0)
    y_ref = h_ref @ w2 + b2

    assert out.shape == (batch, output_dim)
    assert jnp.allclose(out, y_ref, atol=5e-2, rtol=5e-2)

    print("KERNEL_OK")
</pallas_src>

<mosaic_0001>
module attributes {stable_mosaic.version = 11 : i64} {
  func.func @_mlp_kernel(%arg0: i32, %arg1: memref<8x29xf32, #tpu.memory_space<vmem>>, %arg2: memref<8x1xi32, #tpu.memory_space<vmem>>, %arg3: memref<29x128xbf16, #tpu.memory_space<vmem>>, %arg4: memref<8x128xbf16, #tpu.memory_space<vmem>>, %arg5: memref<1x128xf32, #tpu.memory_space<vmem>>, %arg6: memref<128x128xbf16, #tpu.memory_space<vmem>>, %arg7: memref<1x128xf32, #tpu.memory_space<vmem>>, %arg8: memref<8x128xf32, #tpu.memory_space<vmem>>) attributes {dimension_semantics = [#tpu.dimension_semantics<parallel>], iteration_bounds = array<i64: 1>, scalar_prefetch = 0 : i64, scratch_operands = 0 : i64, tpu.core_type = #tpu.core_type<tc>, window_params = [{transform_indices = @transform_0, window_bounds = array<i64: 8, 29>}, {transform_indices = @transform_1, window_bounds = array<i64: 8, 1>}, {pipeline_mode = #tpu.pipeline_mode<synchronous>, transform_indices = @transform_2, window_bounds = array<i64: 29, 128>}, {pipeline_mode = #tpu.pipeline_mode<synchronous>, transform_indices = @transform_3, window_bounds = array<i64: 8, 128>}, {pipeline_mode = #tpu.pipeline_mode<synchronous>, transform_indices = @transform_4, window_bounds = array<i64: 1, 128>}, {pipeline_mode = #tpu.pipeline_mode<synchronous>, transform_indices = @transform_5, window_bounds = array<i64: 128, 128>}, {pipeline_mode = #tpu.pipeline_mode<synchronous>, transform_indices = @transform_6, window_bounds = array<i64: 1, 128>}, {transform_indices = @transform_7, window_bounds = array<i64: 8, 128>}]} {
    %c0 = arith.constant 0 : index
    %c0_0 = arith.constant 0 : index
    %0 = vector.load %arg1[%c0, %c0_0] : memref<8x29xf32, #tpu.memory_space<vmem>>, vector<8x29xf32>
    %1 = arith.truncf %0 : vector<8x29xf32> to vector<8x29xbf16>
    %2 = tpu.iota {dimensions = array<i32: 1>} : vector<8x8xi32>
    %c0_1 = arith.constant 0 : index
    %c0_2 = arith.constant 0 : index
    %3 = vector.load %arg2[%c0_1, %c0_2] : memref<8x1xi32, #tpu.memory_space<vmem>>, vector<8x1xi32>
    %4 = vector.broadcast %3 : vector<8x1xi32> to vector<8x8xi32>
    %5 = arith.cmpi eq, %2, %4 : vector<8x8xi32>
    %6 = arith.extui %5 : vector<8x8xi1> to vector<8x8xi32>
    %7 = arith.sitofp %6 : vector<8x8xi32> to vector<8x8xf32>
    %8 = arith.truncf %7 : vector<8x8xf32> to vector<8x8xbf16>
    %c0_3 = arith.constant 0 : index
    %c0_4 = arith.constant 0 : index
    %9 = vector.load %arg3[%c0_3, %c0_4] : memref<29x128xbf16, #tpu.memory_space<vmem>>, vector<29x128xbf16>
    %cst = arith.constant dense<0.000000e+00> : vector<8x128xf32>
    %10 = tpu.matmul %1, %9, %cst {dimension_numbers = #tpu.dot_dimension_numbers<[1], [0], [0], [1], [0, 0, 1, 1], [], []>} : vector<8x29xbf16>, vector<29x128xbf16>, vector<8x128xf32> -> vector<8x128xf32>
    %c0_5 = arith.constant 0 : index
    %c0_6 = arith.constant 0 : index
    %11 = vector.load %arg4[%c0_5, %c0_6] : memref<8x128xbf16, #tpu.memory_space<vmem>>, vector<8x128xbf16>
    %cst_7 = arith.constant dense<0.000000e+00> : vector<8x128xf32>
    %12 = tpu.matmul %8, %11, %cst_7 {dimension_numbers = #tpu.dot_dimension_numbers<[1], [0], [0], [1], [0, 0, 1, 1], [], []>} : vector<8x8xbf16>, vector<8x128xbf16>, vector<8x128xf32> -> vector<8x128xf32>
    %13 = arith.addf %10, %12 : vector<8x128xf32>
    %c0_8 = arith.constant 0 : index
    %c0_9 = arith.constant 0 : index
    %14 = vector.load %arg5[%c0_8, %c0_9] : memref<1x128xf32, #tpu.memory_space<vmem>>, vector<1x128xf32>
    %15 = vector.broadcast %14 : vector<1x128xf32> to vector<8x128xf32>
    %16 = arith.addf %13, %15 : vector<8x128xf32>
    %cst_10 = arith.constant 0.000000e+00 : f32
    %17 = vector.broadcast %cst_10 : f32 to vector<8x128xf32>
    %18 = arith.maximumf %16, %17 : vector<8x128xf32>
    %19 = arith.truncf %18 : vector<8x128xf32> to vector<8x128xbf16>
    %c0_11 = arith.constant 0 : index
    %c0_12 = arith.constant 0 : index
    %20 = vector.load %arg6[%c0_11, %c0_12] : memref<128x128xbf16, #tpu.memory_space<vmem>>, vector<128x128xbf16>
    %cst_13 = arith.constant dense<0.000000e+00> : vector<8x128xf32>
    %21 = tpu.matmul %19, %20, %cst_13 {dimension_numbers = #tpu.dot_dimension_numbers<[1], [0], [0], [1], [0, 0, 1, 1], [], []>} : vector<8x128xbf16>, vector<128x128xbf16>, vector<8x128xf32> -> vector<8x128xf32>
    %c0_14 = arith.constant 0 : index
    %c0_15 = arith.constant 0 : index
    %22 = vector.load %arg7[%c0_14, %c0_15] : memref<1x128xf32, #tpu.memory_space<vmem>>, vector<1x128xf32>
    %23 = vector.broadcast %22 : vector<1x128xf32> to vector<8x128xf32>
    %24 = arith.addf %21, %23 : vector<8x128xf32>
    %c0_16 = arith.constant 0 : index
    %c0_17 = arith.constant 0 : index
    %25 = vector.load %arg8[%c0_16, %c0_17] : memref<8x128xf32, #tpu.memory_space<vmem>>, vector<8x128xf32>
    tpu.vector_store %arg8[%c0_16, %c0_17], %24 {strides = array<i32>} : memref<8x128xf32, #tpu.memory_space<vmem>>, vector<8x128xf32>,
    return
  }
  func.func @transform_0(%arg0: i32) -> (i32, i32) {
    %c0_i32 = arith.constant 0 : i32
    %c0_i32_0 = arith.constant 0 : i32
    return %arg0, %c0_i32 : i32, i32
  }
  func.func @transform_1(%arg0: i32) -> (i32, i32) {
    %c0_i32 = arith.constant 0 : i32
    %c0_i32_0 = arith.constant 0 : i32
    return %arg0, %c0_i32 : i32, i32
  }
  func.func @transform_2(%arg0: i32) -> (i32, i32) {
    %c0_i32 = arith.constant 0 : i32
    %c0_i32_0 = arith.constant 0 : i32
    %c0_i32_1 = arith.constant 0 : i32
    return %c0_i32, %c0_i32_0 : i32, i32
  }
  func.func @transform_3(%arg0: i32) -> (i32, i32) {
    %c0_i32 = arith.constant 0 : i32
    %c0_i32_0 = arith.constant 0 : i32
    %c0_i32_1 = arith.constant 0 : i32
    return %c0_i32, %c0_i32_0 : i32, i32
  }
  func.func @transform_4(%arg0: i32) -> (i32, i32) {
    %c0_i32 = arith.constant 0 : i32
    %c0_i32_0 = arith.constant 0 : i32
    %c0_i32_1 = arith.constant 0 : i32
    return %c0_i32, %c0_i32_0 : i32, i32
  }
  func.func @transform_5(%arg0: i32) -> (i32, i32) {
    %c0_i32 = arith.constant 0 : i32
    %c0_i32_0 = arith.constant 0 : i32
    %c0_i32_1 = arith.constant 0 : i32
    return %c0_i32, %c0_i32_0 : i32, i32
  }
  func.func @transform_6(%arg0: i32) -> (i32, i32) {
    %c0_i32 = arith.constant 0 : i32
    %c0_i32_0 = arith.constant 0 : i32
    %c0_i32_1 = arith.constant 0 : i32
    return %c0_i32, %c0_i32_0 : i32, i32
  }
  func.func @transform_7(%arg0: i32) -> (i32, i32) {
    %c0_i32 = arith.constant 0 : i32
    %c0_i32_0 = arith.constant 0 : i32
    return %arg0, %c0_i32 : i32, i32
  }
}

</mosaic_0001>

<bundles_post_ra>
// kernel: tpu_custom_call.1
= control target key start
LH: loop header
LB: loop body
LE: loop exit
PB: predicated region body
PF: predicated region fallthrough
CT: control target
= control target key end

     0   :  { %12 = vsyncpa [#allocation3], 0  ;;  %s493_s0 = inlined_call_operand.vmem [shape: f32[8,29], index: 0, kind: input, shape index: {}]   ;;  %s494_s1 = inlined_call_operand.vmem [shape: s32[8,1], index: 1, kind: input, shape index: {}]   ;;  %s495_s2 = inlined_call_operand.hbm [shape: bf16[29,128], index: 2, kind: input, shape index: {}]   ;;  %s496_s3 = inlined_call_operand.hbm [shape: bf16[8,128], index: 3, kind: input, shape index: {}]   ;;  %s497_s4 = inlined_call_operand.vmem [shape: f32[1,128], index: 4, kind: input, shape index: {}]   ;;  %s498_s5 = inlined_call_operand.hbm [shape: bf16[128,128], index: 5, kind: input, shape index: {}]   ;;  %s499_s6 = inlined_call_operand.vmem [shape: f32[1,128], index: 6, kind: input, shape index: {}]   ;;  %s500_s7 = inlined_call_operand.hbm [shape: f32[8,128], index: 7, kind: output, shape index: {}]  }
   0x1   :  { %13 = vsyncpa [#allocation6], 0  ;;  %s37_s26 = sshll.u32 %s496_s3, 4  ;;  %s38_s26 = int_to_ptr.hbm [resolvable:$true] %s37_s26 }
   0x2   :  { %14 = vsyncpa [#allocation4], 0  ;;  %s420_s27 = smov [#allocation5]   ;;  %s23_s8 = sshll.u32 %s495_s2, 4  ;;  %s24_s8 = int_to_ptr.hbm [resolvable:$true] %s23_s8 }
   0x3   :  { %s39_s28 = sshll.u32 %s420_s27, 4  ;;  %s421_s9 = smov [#allocation2]   ;;  %s40_s28 = int_to_ptr.vmem [resolvable:$true] %s39_s28 }
   0x4   :  { %42 = dma.hbm_to_vmem [thread:$0]  %s38_s26, 64, %s40_s28, [#allocation6]  }
   0x5   :  { %s25_s10 = sshll.u32 %s421_s9, 4  ;;  %s422_s11 = smov 64   ;;  %s26_s10 = int_to_ptr.vmem [resolvable:$true] %s25_s10 }
   0x6   :  { %s423_s12 = smov 4   ;;  %s49_s3 = sshll.u32 %s498_s5, 4  ;;  %s50_s3 = int_to_ptr.hbm [resolvable:$true] %s49_s3 }
   0x7   :  { %31 = dma.hbm_to_vmem [thread:$0]  %s24_s8, 256, %s26_s10, [#allocation3], %s422_s11, %s422_s11, %s423_s12  }
   0x8   :  { %s424_s15 = smov [#allocation7]  }
   0x9   :  { %s51_s16 = sshll.u32 %s424_s15, 4  ;;  %s52_s16 = int_to_ptr.vmem [resolvable:$true] %s51_s16 }
   0xa   :  { %57 = dma.hbm_to_vmem [thread:$0]  %s50_s3, 1024, %s52_s16, [#allocation6], %s422_s11, %s422_s11, %s423_s12  }
   0xb   :  { %414 = dma.done.wait [#allocation3], 256  }
   0xc   :  { %415 = vsyncadd [#allocation3], 4294967040 }
   0xd   :  { %416 = dma.done.wait [#allocation6], 1088  }
   0xe   :  { %417 = vsyncadd [#allocation6], 4294966208  ;;  %v425_v0 = vmov 0   ;;  %vm126_vm0 = vcmask 1045504   ;;  %vm127_vm1 = vcmask 1046528   ;;  %v426_v1 = vmov 65535  }
   0xf   :  { %315 = vset.pattern.permute.xlu0 %v425_v0  ;;  %v128_v2 = vsel %vm126_vm0, 4294967295, %v426_v1  ;;  %v77_v3 = vld [vmem:[%s494_s1] sm:$0xff]  ;;  %v261_v4 = vld [vmem:[#allocation2 + $0x8] sm:$0xf]  ;;  %v297_v5 = vld [vmem:[#allocation2 + $0x8] sm:$0x70]  ;;  %v75_v20 = vlaneseq }
  0x10   :  { %v129_v6 = vsel %vm127_vm1, %v128_v2, 0  ;;  %79 = vperm.xlu0 %315, %v77_v3   ;;  %v262_v7 = vor.u32 %v297_v5, %v261_v4  ;;  %v296_v9 = vld [vmem:[#allocation2] sm:$0xff]  ;;  %vm122_vm2 = vcmask 236544   ;;  %v89_v12 = vld [vmem:[#allocation5] sm:$0xf]  ;;  %vm94_vm3 = vcmask 1043456  }
  0x11   :  { %v73_v10 = vld [vmem:[%s493_s0] sm:$0xff]  ;;  %v96_v13 = vsel %vm94_vm3, %v89_v12, 0  ;;  %v305_v14 = vld [vmem:[#allocation7 + $0x38] sm:$0xff]  ;;  %v302_v17 = vld [vmem:[#allocation7 + $0x20] sm:$0xff]  ;;  %v76_v21 = vand.u32 127, %v75_v20  ;;  %v427_v23 = vmov 0.0  }
  0x12   :  { %v131_v8 = vand.u32 %v262_v7, %v129_v6  ;;  %v74_v11 = vpack.c.bf16 %v73_v10, %v73_v10  ;;  %105 = vmatpush.bf16.msra.mxu0 %v96_v13  ;;  %221 = vmatpush.bf16.msra.mxu2 %v305_v14  ;;  %v304_v15 = vld [vmem:[#allocation7 + $0x30] sm:$0xff]  ;;  %v303_v16 = vld [vmem:[#allocation7 + $0x28] sm:$0xff]  ;;  %v301_v18 = vld [vmem:[#allocation7 + $0x18] sm:$0xff]  ;;  %vm90_vm5 = vcmask 64512   ;;  %s428_s21 = smov [#allocation8]   ;;  %s242_s25 = sshll.u32 %s500_s7, 4  ;;  %s243_s25 = int_to_ptr.hbm [resolvable:$true] %s242_s25 }
  0x13   :  { %v300_v19 = vld [vmem:[#allocation7 + $0x10] sm:$0xff]  ;;  %v299_v28 = vld [vmem:[#allocation7 + $0x8] sm:$0xff]  ;;  %v298_v29 = vld [vmem:[#allocation7] sm:$0xff]  ;;  %s240_s22 = sshll.u32 %s428_s21, 4  ;;  %s241_s22 = int_to_ptr.vmem [resolvable:$true] %s240_s22 }
  0x14   :  { %139 = vmatpush.bf16.msra.mxu1 %v131_v8  ;;  %v316_v30 = vld [vmem:[%s497_s4] ss:$0 sm:$0xff] }
  0x15   :  { %v317_v37 = vld [vmem:[%s499_s6] ss:$0 sm:$0xff] }
  0x16   :  { %222 = vmatpush.bf16.msra.mxu2 %v304_v15 }
  0x18   :  { %140 = vmatpush.bf16.msra.mxu1 %v296_v9 }
  0x1a   :  { %223 = vmatpush.bf16.msra.mxu2 %v303_v16 }
  0x1b   :  { %263 = vmatmul.msk.bf16.vlgmr.msra.gmra.mxu1 %vm122_vm2, %v74_v11 }
  0x1e   :  { %224 = vmatpush.bf16.msra.mxu2 %v302_v17 }
  0x22   :  { %225 = vmatpush.bf16.msra.mxu2 %v301_v18 }
  0x26   :  { %226 = vmatpush.bf16.msra.mxu2 %v300_v19 }
  0x2a   :  { %227 = vmatpush.bf16.msra.mxu2 %v299_v28 }
  0x2e   :  { %228 = vmatpush.bf16.msra.mxu2 %v298_v29 }
  0x82   :  { %v80_v22 = vpop.permute.xlu0 %79 }
  0x83   :  { %vm81_vm4 = vcmp.eq.s32.totalorder %v76_v21, %v80_v22 }
  0x84   :  { %v253_v24 = vsel %vm81_vm4, 1.0, %v427_v23 }
  0x85   :  { %v84_v25 = vpack.c.bf16 %v253_v24, %v253_v24 }
  0x87   :  { %254 = vmatmul.msk.bf16.vlgmr.msra.gmra.mxu0 %vm90_vm5, %v84_v25 }
  0x98   :  { %v142_v26 = vpop.f32.mrf.mxu1 }
  0xa0   :  { %v144_v27 = vpop.f32.mrf.mxu1 }
 0x104   :  { %v107_v31 = vpop.f32.mrf.mxu0 }
 0x105   :  { %v143_v32 = vadd.f32 %v142_v26, %v107_v31 }
 0x107   :  { %v150_v33 = vadd.f32 %v316_v30, %v143_v32 }
 0x109   :  { %v151_v34 = vmax.f32 %v150_v33, 0.0 }
 0x10b   :  { %v152_v35 = vpack.c.bf16 %v151_v34, %v151_v34 }
 0x10c   :  { %v109_v36 = vpop.f32.mrf.mxu0 }
 0x10d   :  { %229 = vmatmul.bf16.vlgmr.msra.gmra.mxu2 %v152_v35 }
 0x190   :  { %v230_v38 = vpop.f32.mrf.mxu2 }
 0x191   :  { %v231_v39 = vadd.f32 %v317_v37, %v230_v38 }
 0x193   :  { %234 = vst [vmem:[#allocation8] sm:$0xff] %v231_v39 }
 0x194   :  { %245 = dma.vmem_to_hbm [thread:$0]  %s241_s22, 128, %s243_s25, [#allocation4]  }
 0x198   :  { %v232_v40 = vpop.f32.mrf.mxu2 }
 0x199   :  { %418 = dma.done.wait [#allocation4], 128  }
 0x19a   :  { %419 = vsyncadd [#allocation4], 4294967168 }
 0x19b   :  { %250 = vsyncpa [#allocation3], 1 }
 0x19c   :  { %251 = vsyncpa [#allocation6], 1 }
 0x19d   :  { %252 = vsyncpa [#allocation4], 1 }

</bundles_post_ra>
